<compile_context>
chip_gen: v6e
topology: v6e:2x2x1
jax: 0.10.0
libtpu: 0.0.40
codegen_flags: <defaults>
</compile_context>

<pallas_src>
import functools

import jax
import jax.numpy as jnp
from jax import lax
from jax.experimental import pallas as pl
from jax.experimental.pallas import tpu as pltpu

_LANE = 128
_SUBLANE = 8


def _round_up(x, m):
    return (x + m - 1) // m * m


# Feature-detect BlockSpec(pipeline_mode=...) so grid-invariant weights can be
# single-buffered (halves their VMEM footprint); fall back to the default
# double-buffered pipeline on older jax versions.
try:
    pl.BlockSpec((_SUBLANE, _LANE), lambda i: (0, 0), pipeline_mode=pl.Buffered(1))
    _HAS_SINGLE_BUFFER = True
except (TypeError, AttributeError):
    _HAS_SINGLE_BUFFER = False


def _const_spec(block_shape):
    """BlockSpec for a grid-invariant (weight/bias) input, single-buffered if possible."""
    ndims = len(block_shape)
    index_map = lambda i: (0,) * ndims
    if _HAS_SINGLE_BUFFER:
        return pl.BlockSpec(block_shape, index_map, pipeline_mode=pl.Buffered(1))
    return pl.BlockSpec(block_shape, index_map)


# ----------------------------------------------------------------------------
# Kernels
# ----------------------------------------------------------------------------

def _mlp_kernel_resident(x_ref, w0_ref, b0_ref, wh_ref, bh_ref, wo_ref, bo_ref,
                         o_ref, *, num_hidden_layers, compute_dtype):
    """All weights VMEM-resident across the row grid."""
    cd = compute_dtype
    f32 = jnp.float32

    # First layer: Linear(in, hidden) + ReLU; bf16 MXU matmul, f32 accumulate,
    # downcast fused into the ReLU epilogue (bf16 activation carry).
    h = jnp.dot(x_ref[...], w0_ref[...], preferred_element_type=f32)
    h = jnp.maximum(h + b0_ref[...].astype(f32), 0.0).astype(cd)

    L = num_hidden_layers
    if L <= 8:
        # Small L: static unroll (LLO scheduler hides MXU latency).
        for l in range(L):
            hh = jnp.dot(h, wh_ref[l], preferred_element_type=f32)
            h = jnp.maximum(hh + bh_ref[l].astype(f32), 0.0).astype(cd)
    else:
        # Deep stacks: rolled loop (bounded code size); unroll=2 gives the
        # scheduler a window to overlap dynamic-index reads with MXU drain.
        def body(l, h_carry):
            hh = jnp.dot(h_carry, wh_ref[l], preferred_element_type=f32)
            return jnp.maximum(hh + bh_ref[l].astype(f32), 0.0).astype(cd)
        h = lax.fori_loop(0, L, body, h, unroll=2)

    # Outermost linear (no nonlinearity: outermost_linear=True).
    y = jnp.dot(h, wo_ref[...], preferred_element_type=f32) + bo_ref[...].astype(f32)
    o_ref[...] = y.astype(o_ref.dtype)


def _mlp_kernel_stream(x_ref, w0_ref, b0_ref, wh_hbm, bh_ref, wo_ref, bo_ref,
                       o_ref, wbuf, sem, *, num_hidden_layers, compute_dtype):
    """Hidden-layer weights stay in HBM and are streamed layer-by-layer with a
    manual 2-slot double buffer (for stacks too large for VMEM, e.g. v7x)."""
    cd = compute_dtype
    f32 = jnp.float32
    L = num_hidden_layers

    # Kick off the fetch of hidden layer 0's weights while the first Linear runs.
    if L > 0:
        pltpu.make_async_copy(wh_hbm.at[0], wbuf.at[0], sem.at[0]).start()

    h = jnp.dot(x_ref[...], w0_ref[...], preferred_element_type=f32)
    h = jnp.maximum(h + b0_ref[...].astype(f32), 0.0).astype(cd)

    if L > 0:
        def body(l, h_carry):
            slot = lax.rem(l, 2)

            # Prefetch layer l+1 into the other slot while computing layer l.
            @pl.when(l + 1 < L)
            def _():
                pltpu.make_async_copy(wh_hbm.at[l + 1], wbuf.at[1 - slot],
                                      sem.at[1 - slot]).start()

            # Wait for layer l's weights (size taken from the descriptor shape).
            pltpu.make_async_copy(wh_hbm.at[0], wbuf.at[slot], sem.at[slot]).wait()

            hh = jnp.dot(h_carry, wbuf[slot], preferred_element_type=f32)
            return jnp.maximum(hh + bh_ref[l].astype(f32), 0.0).astype(cd)

        h = lax.fori_loop(0, L, body, h)

    y = jnp.dot(h, wo_ref[...], preferred_element_type=f32) + bo_ref[...].astype(f32)
    o_ref[...] = y.astype(o_ref.dtype)


# ----------------------------------------------------------------------------
# Host-side helpers
# ----------------------------------------------------------------------------

def _auto_tile(n, max_tile):
    """Row tile: >= 2 tiles when possible (both v7x TCs), minimal row padding."""
    if n <= _SUBLANE:
        return _SUBLANE
    n_tiles = max(2, pl.cdiv(n, max_tile))
    return min(max(_round_up(pl.cdiv(n, n_tiles), _SUBLANE), _SUBLANE),
               _round_up(max_tile, _SUBLANE))


def pad_mlp_params(params):
    """Zero-pad all feature dims to the 128-lane width ONCE at init time
    (zero padding is exact through matmul/bias/ReLU)."""
    w0, b0, wh, bh, wo, bo = params
    in_f, hidden = w0.shape
    out_f = wo.shape[1]
    L = wh.shape[0]
    dtype = w0.dtype

    in_p = _round_up(in_f, _LANE)
    hid_p = _round_up(hidden, _LANE)
    out_p = _round_up(out_f, _LANE)
    Lp = max(L, 1)

    w0p = jnp.zeros((in_p, hid_p), dtype).at[:in_f, :hidden].set(w0)
    b0p = jnp.zeros((1, hid_p), dtype).at[0, :hidden].set(b0)
    whp = jnp.zeros((Lp, hid_p, hid_p), dtype).at[:L, :hidden, :hidden].set(wh)
    bhp = jnp.zeros((Lp, 1, hid_p), dtype).at[:L, 0, :hidden].set(bh)
    wop = jnp.zeros((hid_p, out_p), dtype).at[:hidden, :out_f].set(wo)
    bop = jnp.zeros((1, out_p), dtype).at[0, :out_f].set(bo)
    return dict(w0=w0p, b0=b0p, wh=whp, bh=bhp, wo=wop, bo=bop,
                dims=(in_f, hidden, out_f, L))


def mlp_forward_pallas(x, padded, *, weights=None, tile_m=None,
                       force_stream=False, interpret=False):
    """Fused MLP forward. `padded` is the output of pad_mlp_params."""
    w0p, b0p, whp, bhp, wop, bop = (padded["w0"], padded["b0"], padded["wh"],
                                    padded["bh"], padded["wo"], padded["bo"])
    in_f, hidden, out_f, L = padded["dims"]
    compute_dtype = w0p.dtype
    in_p, hid_p = w0p.shape
    out_p = wop.shape[1]
    Lp = whp.shape[0]
    N = x.shape[0]

    # ---- per-chip VMEM budget (generation-aware) -----------------------------
    try:
        vmem_cap = int(pltpu.get_tpu_info().vmem_capacity_bytes)
    except Exception:
        vmem_cap = 64 << 20  # conservative (v7x-sized) fallback
    vmem_budget = max(vmem_cap - (8 << 20), 24 << 20)

    wbytes = jnp.dtype(compute_dtype).itemsize
    bytes_small_w = wbytes * (in_p * hid_p + hid_p + Lp * hid_p
                              + hid_p * out_p + out_p)
    bytes_hidden_w = wbytes * Lp * hid_p * hid_p
    weight_buf_factor = 1 if _HAS_SINGLE_BUFFER else 2
    x_itemsize = jnp.dtype(compute_dtype).itemsize  # x is cast to bf16
    out_itemsize = 4                                 # f32 output

    def _footprint(tm, resident):
        io = 2 * tm * in_p * x_itemsize + 2 * tm * out_p * out_itemsize
        act = 4 * tm * hid_p * 4  # f32 accumulator + bf16 carry + headroom
        if resident:
            w = weight_buf_factor * (bytes_small_w + bytes_hidden_w)
        else:
            w = weight_buf_factor * bytes_small_w + 2 * hid_p * hid_p * wbytes
        return w + io + act + (8 << 20)

    # ---- choose resident vs. streamed path and the row tile ------------------
    max_tile_res = 512 if vmem_budget >= (96 << 20) else 256  # v6e/v5e vs v7x
    if tile_m is not None:
        tm_res = max(_SUBLANE, _round_up(min(tile_m, _round_up(N, _SUBLANE)), _SUBLANE))
    else:
        tm_res = _auto_tile(N, max_tile_res)

    use_stream = force_stream or (_footprint(tm_res, True) > vmem_budget)
    if use_stream:
        # Streaming is HBM-bound unless the row tile is large enough
        # (arithmetic intensity ~ tile_m flops per weight byte).
        tm = tm_res if tile_m is not None else _auto_tile(N, 512)
        need = _footprint(tm, False)
    else:
        tm = tm_res
        need = _footprint(tm, True)
    # TODO(synk): if `need` still exceeds the budget (huge hidden_features),
    # additionally tile the hidden dimension inside the streamed matmuls.
    vmem_limit = int(min(max(need, 32 << 20), vmem_budget))

    N_p = _round_up(max(N, tm), tm)
    grid_m = N_p // tm

    # ---- pad the input rows (cast to bf16 while building the padded copy) ----
    xp = jnp.zeros((N_p, in_p), compute_dtype).at[:N, :in_f].set(
        x.astype(compute_dtype))

    # ---- cost estimate hint for the XLA scheduler -----------------------------
    flops = 2 * N_p * (in_p * hid_p + Lp * hid_p * hid_p + hid_p * out_p)
    w_reads = grid_m if use_stream else 1
    bytes_accessed = (xp.size * x_itemsize + N_p * out_p * out_itemsize
                      + w_reads * (bytes_small_w + bytes_hidden_w))
    cost = pl.CostEstimate(flops=int(flops), transcendentals=0,
                           bytes_accessed=int(bytes_accessed))

    x_spec = pl.BlockSpec((tm, in_p), lambda i: (i, 0))
    out_spec = pl.BlockSpec((tm, out_p), lambda i: (i, 0))
    cparams = pltpu.CompilerParams(dimension_semantics=("parallel",),
                                   vmem_limit_bytes=vmem_limit)

    if not use_stream:
        kernel = functools.partial(_mlp_kernel_resident,
                                   num_hidden_layers=L,
                                   compute_dtype=compute_dtype)
        out_padded = pl.pallas_call(
            kernel,
            out_shape=jax.ShapeDtypeStruct((N_p, out_p), jnp.float32),
            grid=(grid_m,),
            in_specs=[
                x_spec,
                _const_spec((in_p, hid_p)),        # W0 (resident, single-buffered)
                _const_spec((1, hid_p)),           # b0
                _const_spec((Lp, hid_p, hid_p)),   # stacked hidden W (resident)
                _const_spec((Lp, 1, hid_p)),       # stacked hidden b
                _const_spec((hid_p, out_p)),       # W_out
                _const_spec((1, out_p)),           # b_out
            ],
            out_specs=out_spec,
            compiler_params=cparams,
            cost_estimate=cost,
            interpret=interpret,
        )(xp, w0p, b0p, whp, bhp, wop, bop)
    else:
        kernel = functools.partial(_mlp_kernel_stream,
                                   num_hidden_layers=L,
                                   compute_dtype=compute_dtype)
        out_padded = pl.pallas_call(
            kernel,
            out_shape=jax.ShapeDtypeStruct((N_p, out_p), jnp.float32),
            grid=(grid_m,),
            in_specs=[
                x_spec,
                _const_spec((in_p, hid_p)),        # W0 (small, resident)
                _const_spec((1, hid_p)),           # b0
                pl.BlockSpec(memory_space=pl.ANY),  # hidden W stack stays in HBM
                _const_spec((Lp, 1, hid_p)),       # hidden biases (small, resident)
                _const_spec((hid_p, out_p)),       # W_out
                _const_spec((1, out_p)),           # b_out
            ],
            out_specs=out_spec,
            scratch_shapes=[
                pltpu.VMEM((2, hid_p, hid_p), compute_dtype),  # weight double buffer
                pltpu.SemaphoreType.DMA((2,)),
            ],
            compiler_params=cparams,
            cost_estimate=cost,
            interpret=interpret,
        )(xp, w0p, b0p, whp, bhp, wop, bop)

    out = out_padded[:N, :out_f]
    if weights is not None:          # MLP.forward's optional per-output weights
        out = out * weights
    return out


# ----------------------------------------------------------------------------
# Init + reference
# ----------------------------------------------------------------------------

def init_mlp_params(key, in_features, out_features, num_hidden_layers,
                    hidden_features, dtype=jnp.bfloat16):
    """Deterministic init matching init_weights_normal (kaiming_normal, fan_in,
    relu) + PyTorch Linear default bias init."""
    keys = jax.random.split(key, 6)

    def kaiming(k, fan_in, shape):
        std = jnp.sqrt(2.0 / fan_in)
        return (std * jax.random.normal(k, shape)).astype(dtype)

    def bias(k, fan_in, shape):
        bound = 1.0 / jnp.sqrt(fan_in)
        return jax.random.uniform(k, shape, minval=-bound, maxval=bound).astype(dtype)

    # Weights stored as (in, out) — transposed vs PyTorch Linear.
    w0 = kaiming(keys[0], in_features, (in_features, hidden_features))
    b0 = bias(keys[1], in_features, (hidden_features,))
    wh = kaiming(keys[2], hidden_features,
                 (num_hidden_layers, hidden_features, hidden_features))
    bh = bias(keys[3], hidden_features, (num_hidden_layers, hidden_features))
    wo = kaiming(keys[4], hidden_features, (hidden_features, out_features))
    bo = bias(keys[5], hidden_features, (out_features,))
    return (w0, b0, wh, bh, wo, bo)


def mlp_forward_ref(x, params):
    """Pure-JAX reference (same bf16-carry / f32-accumulate recipe)."""
    w0, b0, wh, bh, wo, bo = params
    cd = w0.dtype
    f32 = jnp.float32
    h = jnp.dot(x.astype(cd), w0, preferred_element_type=f32) + b0.astype(f32)
    h = jnp.maximum(h, 0.0).astype(cd)
    for l in range(wh.shape[0]):
        h = jnp.dot(h, wh[l], preferred_element_type=f32) + bh[l].astype(f32)
        h = jnp.maximum(h, 0.0).astype(cd)
    return jnp.dot(h, wo, preferred_element_type=f32) + bo.astype(f32)


if __name__ == "__main__":
    # Small shapes consistent with the module's forward: coords (N, in_features)
    in_features = 4
    out_features = 2
    num_hidden_layers = 2
    hidden_features = 32
    N = 16

    key = jax.random.PRNGKey(0)
    k_x, k_p = jax.random.split(key)
    coords = jax.random.normal(k_x, (N, in_features), dtype=jnp.float32)
    params = init_mlp_params(k_p, in_features, out_features,
                             num_hidden_layers, hidden_features,
                             dtype=jnp.bfloat16)
    padded = pad_mlp_params(params)   # padded once, reused across calls

    ref = mlp_forward_ref(coords, params)

    # 1) VMEM-resident weight path (default on all chips for small stacks).
    out = jax.block_until_ready(mlp_forward_pallas(coords, padded))
    assert out.shape == (N, out_features)
    assert jnp.allclose(out, ref, atol=2e-2, rtol=2e-2), \
        float(jnp.max(jnp.abs(out - ref)))

    # 2) HBM-streamed hidden-weight path (selected automatically when the
    #    stack exceeds the chip's VMEM budget, e.g. large hidden on v7x).
    out_s = jax.block_until_ready(
        mlp_forward_pallas(coords, padded, force_stream=True))
    assert out_s.shape == (N, out_features)
    assert jnp.allclose(out_s, ref, atol=2e-2, rtol=2e-2), \
        float(jnp.max(jnp.abs(out_s - ref)))

    print("KERNEL_OK")
</pallas_src>

<mosaic_0001>
module attributes {stable_mosaic.version = 11 : i64} {
  func.func @_mlp_kernel_resident(%arg0: i32, %arg1: memref<8x128xbf16, #tpu.memory_space<vmem>>, %arg2: memref<128x128xbf16, #tpu.memory_space<vmem>>, %arg3: memref<1x128xbf16, #tpu.memory_space<vmem>>, %arg4: memref<2x128x128xbf16, #tpu.memory_space<vmem>>, %arg5: memref<2x1x128xbf16, #tpu.memory_space<vmem>>, %arg6: memref<128x128xbf16, #tpu.memory_space<vmem>>, %arg7: memref<1x128xbf16, #tpu.memory_space<vmem>>, %arg8: memref<8x128xf32, #tpu.memory_space<vmem>>) attributes {dimension_semantics = [#tpu.dimension_semantics<parallel>], iteration_bounds = array<i64: 2>, scalar_prefetch = 0 : i64, scratch_operands = 0 : i64, tpu.core_type = #tpu.core_type<tc>, window_params = [{transform_indices = @transform_0, window_bounds = array<i64: 8, 128>}, {pipeline_mode = #tpu.pipeline_mode<synchronous>, transform_indices = @transform_1, window_bounds = array<i64: 128, 128>}, {pipeline_mode = #tpu.pipeline_mode<synchronous>, transform_indices = @transform_2, window_bounds = array<i64: 1, 128>}, {pipeline_mode = #tpu.pipeline_mode<synchronous>, transform_indices = @transform_3, window_bounds = array<i64: 2, 128, 128>}, {pipeline_mode = #tpu.pipeline_mode<synchronous>, transform_indices = @transform_4, window_bounds = array<i64: 2, 1, 128>}, {pipeline_mode = #tpu.pipeline_mode<synchronous>, transform_indices = @transform_5, window_bounds = array<i64: 128, 128>}, {pipeline_mode = #tpu.pipeline_mode<synchronous>, transform_indices = @transform_6, window_bounds = array<i64: 1, 128>}, {transform_indices = @transform_7, window_bounds = array<i64: 8, 128>}]} {
    %c0 = arith.constant 0 : index
    %c0_0 = arith.constant 0 : index
    %0 = vector.load %arg1[%c0, %c0_0] : memref<8x128xbf16, #tpu.memory_space<vmem>>, vector<8x128xbf16>
    %c0_1 = arith.constant 0 : index
    %c0_2 = arith.constant 0 : index
    %1 = vector.load %arg2[%c0_1, %c0_2] : memref<128x128xbf16, #tpu.memory_space<vmem>>, vector<128x128xbf16>
    %cst = arith.constant dense<0.000000e+00> : vector<8x128xf32>
    %2 = tpu.matmul %0, %1, %cst {dimension_numbers = #tpu.dot_dimension_numbers<[1], [0], [0], [1], [0, 0, 1, 1], [], []>} : vector<8x128xbf16>, vector<128x128xbf16>, vector<8x128xf32> -> vector<8x128xf32>
    %c0_3 = arith.constant 0 : index
    %c0_4 = arith.constant 0 : index
    %3 = vector.load %arg3[%c0_3, %c0_4] : memref<1x128xbf16, #tpu.memory_space<vmem>>, vector<1x128xbf16>
    %4 = arith.extf %3 : vector<1x128xbf16> to vector<1x128xf32>
    %5 = vector.broadcast %4 : vector<1x128xf32> to vector<8x128xf32>
    %6 = arith.addf %2, %5 : vector<8x128xf32>
    %cst_5 = arith.constant 0.000000e+00 : f32
    %7 = vector.broadcast %cst_5 : f32 to vector<8x128xf32>
    %8 = arith.maximumf %6, %7 : vector<8x128xf32>
    %9 = arith.truncf %8 : vector<8x128xf32> to vector<8x128xbf16>
    %c0_6 = arith.constant 0 : index
    %c0_7 = arith.constant 0 : index
    %c0_8 = arith.constant 0 : index
    %10 = vector.load %arg4[%c0_6, %c0_7, %c0_8] : memref<2x128x128xbf16, #tpu.memory_space<vmem>>, vector<1x128x128xbf16>
    %11 = vector.shape_cast %10 : vector<1x128x128xbf16> to vector<128x128xbf16>
    %cst_9 = arith.constant dense<0.000000e+00> : vector<8x128xf32>
    %12 = tpu.matmul %9, %11, %cst_9 {dimension_numbers = #tpu.dot_dimension_numbers<[1], [0], [0], [1], [0, 0, 1, 1], [], []>} : vector<8x128xbf16>, vector<128x128xbf16>, vector<8x128xf32> -> vector<8x128xf32>
    %c0_10 = arith.constant 0 : index
    %c0_11 = arith.constant 0 : index
    %c0_12 = arith.constant 0 : index
    %13 = vector.load %arg5[%c0_10, %c0_11, %c0_12] : memref<2x1x128xbf16, #tpu.memory_space<vmem>>, vector<1x1x128xbf16>
    %14 = vector.shape_cast %13 : vector<1x1x128xbf16> to vector<1x128xbf16>
    %15 = arith.extf %14 : vector<1x128xbf16> to vector<1x128xf32>
    %16 = vector.broadcast %15 : vector<1x128xf32> to vector<8x128xf32>
    %17 = arith.addf %12, %16 : vector<8x128xf32>
    %cst_13 = arith.constant 0.000000e+00 : f32
    %18 = vector.broadcast %cst_13 : f32 to vector<8x128xf32>
    %19 = arith.maximumf %17, %18 : vector<8x128xf32>
    %20 = arith.truncf %19 : vector<8x128xf32> to vector<8x128xbf16>
    %c1 = arith.constant 1 : index
    %c0_14 = arith.constant 0 : index
    %c0_15 = arith.constant 0 : index
    %21 = vector.load %arg4[%c1, %c0_14, %c0_15] : memref<2x128x128xbf16, #tpu.memory_space<vmem>>, vector<1x128x128xbf16>
    %22 = vector.shape_cast %21 : vector<1x128x128xbf16> to vector<128x128xbf16>
    %cst_16 = arith.constant dense<0.000000e+00> : vector<8x128xf32>
    %23 = tpu.matmul %20, %22, %cst_16 {dimension_numbers = #tpu.dot_dimension_numbers<[1], [0], [0], [1], [0, 0, 1, 1], [], []>} : vector<8x128xbf16>, vector<128x128xbf16>, vector<8x128xf32> -> vector<8x128xf32>
    %c1_17 = arith.constant 1 : index
    %c0_18 = arith.constant 0 : index
    %c0_19 = arith.constant 0 : index
    %24 = vector.load %arg5[%c1_17, %c0_18, %c0_19] : memref<2x1x128xbf16, #tpu.memory_space<vmem>>, vector<1x1x128xbf16>
    %25 = vector.shape_cast %24 : vector<1x1x128xbf16> to vector<1x128xbf16>
    %26 = arith.extf %25 : vector<1x128xbf16> to vector<1x128xf32>
    %27 = vector.broadcast %26 : vector<1x128xf32> to vector<8x128xf32>
    %28 = arith.addf %23, %27 : vector<8x128xf32>
    %cst_20 = arith.constant 0.000000e+00 : f32
    %29 = vector.broadcast %cst_20 : f32 to vector<8x128xf32>
    %30 = arith.maximumf %28, %29 : vector<8x128xf32>
    %31 = arith.truncf %30 : vector<8x128xf32> to vector<8x128xbf16>
    %c0_21 = arith.constant 0 : index
    %c0_22 = arith.constant 0 : index
    %32 = vector.load %arg6[%c0_21, %c0_22] : memref<128x128xbf16, #tpu.memory_space<vmem>>, vector<128x128xbf16>
    %cst_23 = arith.constant dense<0.000000e+00> : vector<8x128xf32>
    %33 = tpu.matmul %31, %32, %cst_23 {dimension_numbers = #tpu.dot_dimension_numbers<[1], [0], [0], [1], [0, 0, 1, 1], [], []>} : vector<8x128xbf16>, vector<128x128xbf16>, vector<8x128xf32> -> vector<8x128xf32>
    %c0_24 = arith.constant 0 : index
    %c0_25 = arith.constant 0 : index
    %34 = vector.load %arg7[%c0_24, %c0_25] : memref<1x128xbf16, #tpu.memory_space<vmem>>, vector<1x128xbf16>
    %35 = arith.extf %34 : vector<1x128xbf16> to vector<1x128xf32>
    %36 = vector.broadcast %35 : vector<1x128xf32> to vector<8x128xf32>
    %37 = arith.addf %33, %36 : vector<8x128xf32>
    %c0_26 = arith.constant 0 : index
    %c0_27 = arith.constant 0 : index
    %38 = vector.load %arg8[%c0_26, %c0_27] : memref<8x128xf32, #tpu.memory_space<vmem>>, vector<8x128xf32>
    tpu.vector_store %arg8[%c0_26, %c0_27], %37 {strides = array<i32>} : memref<8x128xf32, #tpu.memory_space<vmem>>, vector<8x128xf32>,
    return
  }
  func.func @transform_0(%arg0: i32) -> (i32, i32) {
    %c0_i32 = arith.constant 0 : i32
    %c0_i32_0 = arith.constant 0 : i32
    return %arg0, %c0_i32 : i32, i32
  }
  func.func @transform_1(%arg0: i32) -> (i32, i32) {
    %c0_i32 = arith.constant 0 : i32
    %c0_i32_0 = arith.constant 0 : i32
    %c0_i32_1 = arith.constant 0 : i32
    return %c0_i32, %c0_i32_0 : i32, i32
  }
  func.func @transform_2(%arg0: i32) -> (i32, i32) {
    %c0_i32 = arith.constant 0 : i32
    %c0_i32_0 = arith.constant 0 : i32
    %c0_i32_1 = arith.constant 0 : i32
    return %c0_i32, %c0_i32_0 : i32, i32
  }
  func.func @transform_3(%arg0: i32) -> (i32, i32, i32) {
    %c0_i32 = arith.constant 0 : i32
    %c0_i32_0 = arith.constant 0 : i32
    %c0_i32_1 = arith.constant 0 : i32
    %c0_i32_2 = arith.constant 0 : i32
    return %c0_i32, %c0_i32_0, %c0_i32_1 : i32, i32, i32
  }
  func.func @transform_4(%arg0: i32) -> (i32, i32, i32) {
    %c0_i32 = arith.constant 0 : i32
    %c0_i32_0 = arith.constant 0 : i32
    %c0_i32_1 = arith.constant 0 : i32
    %c0_i32_2 = arith.constant 0 : i32
    return %c0_i32, %c0_i32_0, %c0_i32_1 : i32, i32, i32
  }
  func.func @transform_5(%arg0: i32) -> (i32, i32) {
    %c0_i32 = arith.constant 0 : i32
    %c0_i32_0 = arith.constant 0 : i32
    %c0_i32_1 = arith.constant 0 : i32
    return %c0_i32, %c0_i32_0 : i32, i32
  }
  func.func @transform_6(%arg0: i32) -> (i32, i32) {
    %c0_i32 = arith.constant 0 : i32
    %c0_i32_0 = arith.constant 0 : i32
    %c0_i32_1 = arith.constant 0 : i32
    return %c0_i32, %c0_i32_0 : i32, i32
  }
  func.func @transform_7(%arg0: i32) -> (i32, i32) {
    %c0_i32 = arith.constant 0 : i32
    %c0_i32_0 = arith.constant 0 : i32
    return %arg0, %c0_i32 : i32, i32
  }
}

</mosaic_0001>

<bundles_post_ra>
// kernel: tpu_custom_call.1
= control target key start
LH: loop header
LB: loop body
LE: loop exit
PB: predicated region body
PF: predicated region fallthrough
CT: control target
= control target key end

     0   :  { %s1662_s0 = inlined_call_operand.hbm [shape: bf16[16,128], index: 0, kind: input, shape index: {}]   ;;  %s1663_s1 = inlined_call_operand.hbm [shape: bf16[128,128], index: 1, kind: input, shape index: {}]   ;;  %s1664_s2 = inlined_call_operand.vmem [shape: bf16[1,128], index: 2, kind: input, shape index: {}]   ;;  %s1665_s3 = inlined_call_operand.hbm [shape: bf16[2,128,128], index: 3, kind: input, shape index: {}]   ;;  %s1666_s4 = inlined_call_operand.vmem [shape: bf16[2,1,128], index: 4, kind: input, shape index: {}]   ;;  %s1667_s5 = inlined_call_operand.hbm [shape: bf16[128,128], index: 5, kind: input, shape index: {}]   ;;  %s1668_s6 = inlined_call_operand.vmem [shape: bf16[1,128], index: 6, kind: input, shape index: {}]   ;;  %s1669_s7 = inlined_call_operand.hbm [shape: f32[16,128], index: 7, kind: output, shape index: {}]  }
   0x1   :  { %1674 = sst [smem:[#allocation15_spill]] %s1663_s1 }
   0x2   :  { %1675 = sst [smem:[#allocation16_spill]] %s1665_s3 }
   0x3   :  { %12 = vsyncpa [#allocation3], 0 }
   0x4   :  { %14 = vsyncpa [#allocation3 + $0x1], 0 }
   0x5   :  { %15 = vsyncpa [#allocation6], 0 }
   0x6   :  { %16 = vsyncpa [#allocation9], 0 }
   0x7   :  { %17 = vsyncpa [#allocation4], 0 }
   0x8   :  { %19 = vsyncpa [#allocation4 + $0x1], 0  ;;  %s1411_s24 = smov 0   ;;  %s1413_s25 = smov 0  }
   0x9   :  { %s1415_s26 = smov 0   ;;  %s1417_s27 = smov 0  }
   0xa LB: > { %s1432_s28 = sadd.s32 4294967295, %s1360_s27   ;;  %s902_s29 = sadd.s32 4294967294, %s1360_s27   ;;  %s1360_s27 = sphi %s1417_s27, %s1697_s27   ;;  %s1356_s26 = sphi %s1415_s26, %s1696_s26   ;;  %s1352_s25 = sphi %s1413_s25, %s1695_s25   ;;  %s1348_s24 = sphi %s1411_s24, %s1694_s24  }
   0xb   : > { %p45_p0 = scmp.ne.s32.totalorder %s1352_s25, %s1348_s24  ;;  %p1670_p1 = scmp.eq.s32.totalorder %s1432_s28, 0 }
   0xc   : > { %p201_p3 = scmp.eq.s32.totalorder %s902_s29, 1  ;;  %p903_p5 = scmp.ge.s32.totalorder %s1360_s27, 1 }
   0xd   : > { %p1441_p4 = por %p1670_p1, %p45_p0  ;;  %p208_p7 = scmp.lt.s32.totalorder %s1360_s27, 3 }
   0xe   : > { %p1446_p6 = por %p201_p3, %p45_p0  ;;  %s1362_s10 = smov [#allocation5]  }
   0xf   : > { %s1676_s30 = scalar_select %p1441_p4, 1, 0 }
  0x10   : > { %s1677_s8 = scalar_select %p1446_p6, 1, 0 }
  0x11   : > { %p1451_p8 = pnand %p903_p5, %p208_p7  ;;  %s220_s11 = sshll.u32 %s1362_s10, 4  ;;  %s221_s11 = int_to_ptr.vmem [resolvable:$true] %s220_s11 }
  0x12   : > { %s1363_s13 = smov [#allocation7]   ;;  %s1364_s15 = smov [#allocation8]  }
  0x13   : > { %s1678_s9 = scalar_select %p1451_p8, 1, 0 }
  0x14   : > { %p1085_p9 = pneg %p1451_p8  ;;  %s236_s14 = sshll.u32 %s1363_s13, 4  ;;  %s237_s14 = int_to_ptr.vmem [resolvable:$true] %s236_s14 }
  0x15   : > { %s252_s16 = sshll.u32 %s1364_s15, 4  ;;  %s1193_s17 = scalar_lea.vmem %s221_s11, 1024  ;;  %s253_s16 = int_to_ptr.vmem [resolvable:$true] %s252_s16 }
  0x16   : > { %p1460_p11 = pnand %p1085_p9, %p1670_p1  ;;  %p1194_p13 = scmp.ne.s32.totalorder %s221_s11, %s1193_s17 }
  0x17   : > { %p1201_p5 = scmp.lt.s32.totalorder %s221_s11, %s221_s11  ;;  %p1202_p7 = scmp.lt.s32.totalorder %s1193_s17, %s1193_s17 }
  0x18   : > { %p1184_p12 = pneg %p1460_p11 }
  0x19   : > { %p1203_p9 = por %p1202_p7, %p1201_p5 }
  0x1a   : > { %p1196_p0 = pnand %p1194_p13, %p1184_p12 }
  0x1c   : > { %p1197_p3 = pneg %p1196_p0 }
  0x1e   : > { %p1204_p10 = pnand %p1203_p9, %p1197_p3 }
  0x20   : > { %1207 = shalt.err (!%p1204_p10)
}
  0x21   : > { %s1365_s18 = smov 64   ;;  %s1366_s19 = smov 4  }
  0x22   : > { %s1680_s1 = sld [smem:[#allocation15_spill]]  ;;  %s1219_s22 = scalar_lea.vmem %s237_s14, 2048 }
  0x23   : > { %p1220_p1 = scmp.ne.s32.totalorder %s237_s14, %s1219_s22  ;;  %p1227_p2 = scmp.lt.s32.totalorder %s237_s14, %s237_s14 }
  0x24   : > { %p1228_p6 = scmp.lt.s32.totalorder %s1219_s22, %s1219_s22 }
  0x25   : > { %p1222_p13 = pnand %p1220_p1, %p1184_p12 }
  0x26   : > { %p1229_p5 = por %p1228_p6, %p1227_p2 }
  0x27   : > { %p1223_p0 = pneg %p1222_p13 }
  0x28   : > { %1088 = dma.hbm_to_vmem [thread:$0]  (!%p1460_p11), %s1680_s1, 1024, %s221_s11, [#allocation6], %s1365_s18, %s1365_s18, %s1366_s19  }
  0x29   : > { %p1230_p3 = pnand %p1229_p5, %p1223_p0 }
  0x2b   : > { %1233 = shalt.err (!%p1230_p3)
}
  0x2c   : > { %s1681_s3 = sld [smem:[#allocation16_spill]]  ;;  %s1245_s10 = scalar_lea.vmem %s253_s16, 1024 }
  0x2d   : > { %p1246_p10 = scmp.ne.s32.totalorder %s253_s16, %s1245_s10  ;;  %p1253_p9 = scmp.lt.s32.totalorder %s253_s16, %s253_s16 }
  0x2e   : > { %p1254_p13 = scmp.lt.s32.totalorder %s1245_s10, %s1245_s10 }
  0x2f   : > { %p1248_p7 = pnand %p1246_p10, %p1184_p12 }
  0x30   : > { %p1255_p4 = por %p1254_p13, %p1253_p9 }
  0x31   : > { %p1249_p1 = pneg %p1248_p7 }
  0x32   : > { %1091 = dma.hbm_to_vmem [thread:$0]  (!%p1460_p11), %s1681_s3, 2048, %s237_s14, [#allocation6], %s1365_s18, %s1365_s18, %s1366_s19  }
  0x33   : > { %p1256_p2 = pnand %p1255_p4, %p1249_p1 }
  0x35   : > { %1259 = shalt.err (!%p1256_p2)
}
  0x36   : > { %1094 = dma.hbm_to_vmem [thread:$0]  (!%p1460_p11), %s1667_s5, 1024, %s253_s16, [#allocation9], %s1365_s18, %s1365_s18, %s1366_s19  }
  0x37   : > { %s1491_s14 = sadd.s32 1, %s1360_s27   ;;  %s32_s12 = sadd.s32 1, %s1356_s26 }
  0x38   : > { %s29_s15 = ssub.s32 %s1360_s27, %s1491_s14  ;;  %p39_p6 = scmp.ne.s32.totalorder %s1356_s26, %s1352_s25 }
  0x39   : > { %p30_p4 = scmp.eq.s32.totalorder %s29_s15, 0  ;;  %p40_p12 = scmp.eq.s32.totalorder %s1360_s27, 0 }
  0x3a   : > { %p1106_p0 = scmp.lt.s32.totalorder %s1360_s27, 2  ;;  %p1682_p3 = scmp.eq.s32.totalorder %s1432_s28, 1 }
  0x3b   : > { %s1501_s17 = scalar_select %p30_p4, %s1356_s26, %s32_s12  }
  0x3c   : > { %p41_p5 = por %p40_p12, %p39_p6  ;;  %p1505_p10 = por %p1682_p3, %p39_p6 }
  0x3d   : > { %s269_s21 = sand.u32 1, %s1356_s26   ;;  %s909_s22 = sshll.u32 %s1360_s27, 6 }
  0x3e   : > { %s1683_s20 = scalar_select %p1505_p10, 1, 0 }
  0x3f   : > { %s908_s16 = sshll.u32 %s269_s21, 2  ;;  %s1514_s23 = scalar_lea.hbm %s1662_s0, %s909_s22 }
  0x40   : > { %s273_s29 = scalar_lea.vmem [#allocation2], %s908_s16  ;;  %p1516_p11 = pnand %p1106_p0, %p41_p5 }
  0x41   : > { %s280_s10 = sshll.u32 %s273_s29, 4  ;;  %s270_s13 = scalar_lea.sflag [#allocation3], %s269_s21  ;;  %s281_s10 = int_to_ptr.vmem [resolvable:$true] %s280_s10 }
  0x42   : > { %s1260_s15 = scalar_lea.hbm %s1514_s23, 64  ;;  %p1262_p1 = pneg %p1516_p11 }
  0x43   : > { %p1261_p7 = scmp.ne.s32.totalorder %s1514_s23, %s1260_s15  ;;  %s1265_s18 = scalar_lea.hbm %s1662_s0, 128 }
  0x44   : > { %p1266_p2 = scmp.lt.s32.totalorder %s1514_s23, %s1662_s0  ;;  %p1267_p4 = scmp.lt.s32.totalorder %s1265_s18, %s1260_s15 }
  0x45   : > { %p1263_p9 = pnand %p1262_p1, %p1261_p7 }
  0x46   : > { %p1268_p6 = por %p1267_p4, %p1266_p2 }
  0x47   : > { %p1264_p13 = pneg %p1263_p9 }
  0x49   : > { %p1269_p12 = pnand %p1268_p6, %p1264_p13 }
  0x4b   : > { %1272 = shalt.err (!%p1269_p12)
}
  0x4c   : > { %s1273_s29 = scalar_lea.vmem %s281_s10, 64  ;;  %s1367_s21 = smov [#allocation2]  }
  0x4d   : > { %p1274_p0 = scmp.ne.s32.totalorder %s281_s10, %s1273_s29  ;;  %s1278_s1 = sshll.u32 %s1367_s21, 4  ;;  %s1279_s1 = int_to_ptr.vmem [resolvable:$false] %s1278_s1 }
  0x4e   : > { %s1280_s3 = scalar_lea.vmem %s1279_s1, 128  ;;  %p1281_p7 = scmp.lt.s32.totalorder %s281_s10, %s1279_s1 }
  0x4f   : > { %p1276_p5 = pnand %p1274_p0, %p1262_p1  ;;  %p1282_p9 = scmp.lt.s32.totalorder %s1280_s3, %s1273_s29 }
  0x51   : > { %p1277_p3 = pneg %p1276_p5  ;;  %p1283_p10 = por %p1282_p9, %p1281_p7 }
  0x53   : > { %p1284_p8 = pnand %p1283_p10, %p1277_p3 }
  0x55   : > { %1287 = shalt.err (!%p1284_p8)
}
  0x56   : > { %1098 = dma.hbm_to_vmem [thread:$0]  (!%p1516_p11), %s1514_s23, 64, %s281_s10, %s270_s13  }
  0x57   : > { %p1685_p13 = scmp.ne.s32.totalorder %s1678_s9, 0 }
  0x58   : > { %s1537_s15 = sand.u32 (!%p1685_p13), 1, %s1352_s25   ;;  %p1686_p1 = scmp.ne.s32.totalorder (!%p1685_p13), %s1676_s30, 0 }
  0x59   : > { %289 = sbr.rel (%p1685_p13) target bundleno = 941 (0x3ad), region = 48  ;;  %s911_s12 = sshll.u32 (!%p1685_p13), %s1537_s15, 2 }
  0x5a   : > { %s292_s22 = scalar_lea.sflag (!%p1685_p13), [#allocation3], %s1537_s15  ;;  %s1541_s1 = scalar_lea.vmem (!%p1685_p13), [#allocation2], %s911_s12 }
  0x5e   : > { %1331 = dma.done.wait (%p1686_p1), %s292_s22, 64  }
  0x5f   : > { %1333 = vsyncadd (%p1686_p1), %s292_s22, 4294967232  ;;  %p1687_p8 = scmp.eq.s32.totalorder %s1432_s28, 0 }
  0x61   : > { %1335 = dma.done.wait (%p1687_p8), [#allocation6], 3072   ;;  %p1688_p10 = pmov %p1687_p8 }
  0x62   : > { %p1689_p11 = pmov %p1687_p8 }
  0x63   : > { %1337 = vsyncadd (%p1688_p10), [#allocation6], 4294964224 }
  0x64   : > { %1339 = dma.done.wait (%p1689_p11), [#allocation9], 1024   ;;  %p1690_p2 = pmov %p1687_p8 }
  0x65   : > { %v1368_v0 = vmov 0.0   ;;  %vm1369_vm0 = vmmov 0   ;;  %v1150_v1 = vld [vmem:[#allocation5 + $0x38] sm:$0xff]   ;;  %v1151_v2 = vld [vmem:[#allocation5 + $0x30] sm:$0xff]   ;;  %v1152_v3 = vld [vmem:[#allocation5 + $0x28] sm:$0xff]   ;;  %v358_v24 = vlaneseq  ;;  %s915_s19 = sshll.u32 %s1537_s15, 3 }
  0x66   : > { %1341 = vsyncadd (%p1690_p2), [#allocation9], 4294966272  ;;  %989 = vmatprep.subr.bf16.mxu0 %v1368_v0  ;;  %1005 = vmatprep.mubr.msk.bf16.mxu0 %vm1369_vm0, %v1368_v0  ;;  %v1158_v4 = vld [vmem:[#allocation7 + $0x38] sm:$0xff]   ;;  %v1153_v5 = vld [vmem:[#allocation5 + $0x20] sm:$0xff]   ;;  %s950_s16 = sshll.u32 %s1432_s28, 7  ;;  %s337_s29 = scalar_lea.vmem [#allocation10], %s915_s19 }
  0x67   : > { %1009 = vmatprep.subr.bf16.mxu1 %v1368_v0  ;;  %1025 = vmatprep.mubr.msk.bf16.mxu1 %vm1369_vm0, %v1368_v0  ;;  %v1159_v6 = vld [vmem:[#allocation7 + $0x30] sm:$0xff]   ;;  %v1154_v7 = vld [vmem:[#allocation5 + $0x18] sm:$0xff]   ;;  %v1160_v8 = vld [vmem:[#allocation7 + $0x28] sm:$0xff]   ;;  %v359_v25 = vshrl.u32 %v358_v24, 7  ;;  %s803_s21 = sshll.u32 %s337_s29, 4  ;;  %s790_s3 = scalar_lea.sflag [#allocation4], %s1537_s15  ;;  %s1621_s21 = int_to_ptr.vmem [resolvable:$true] %s803_s21 }
  0x68   : > { %990 = vmatpush3.bf16.msra.mxu0 %v1150_v1  ;;  %1010 = vmatpush3.bf16.msra.mxu1 %v1158_v4  ;;  %v1155_v9 = vld [vmem:[#allocation5 + $0x10] sm:$0xff]   ;;  %v1161_v10 = vld [vmem:[#allocation7 + $0x20] sm:$0xff]   ;;  %v1156_v11 = vld [vmem:[#allocation5 + $0x8] sm:$0xff]   ;;  %s1288_s30 = scalar_lea.vmem %s1621_s21, 128  ;;  %p1691_p6 = scmp.ne.s32.totalorder %s1683_s20, 0 }
  0x69   : > { %991 = vmatprep.subr.bf16.mxu0 %v1368_v0  ;;  %1011 = vmatprep.subr.bf16.mxu1 %v1368_v0  ;;  %v1162_v12 = vld [vmem:[#allocation7 + $0x18] sm:$0xff]   ;;  %v1157_v13 = vld [vmem:[#allocation5] sm:$0xff]   ;;  %v1163_v14 = vld [vmem:[#allocation7 + $0x10] sm:$0xff]   ;;  %v1589_v28 = vsub.s32 0, %v359_v25  ;;  %p1289_p4 = scmp.ne.s32.totalorder %s1621_s21, %s1288_s30  ;;  %s1370_s28 = smov [#allocation10]  }
  0x6a   : > { %v339_v15 = vld [vmem:[%s1541_s1] sm:$0xf]  ;;  %v1164_v16 = vld [vmem:[#allocation7 + $0x8] sm:$0xff]   ;;  %v1165_v17 = vld [vmem:[#allocation7] sm:$0xff]   ;;  %s1619_s1 = scalar_lea.hbm %s1669_s7, %s950_s16  ;;  %s1292_s9 = sshll.u32 %s1370_s28, 4  ;;  %s1293_s9 = int_to_ptr.vmem [resolvable:$false] %s1292_s9 }
  0x6b   : > { %v1166_v18 = vld [vmem:[#allocation7 + $0x78] sm:$0xff]   ;;  %v1167_v19 = vld [vmem:[#allocation7 + $0x70] sm:$0xff]   ;;  %v1168_v20 = vld [vmem:[#allocation7 + $0x68] sm:$0xff]   ;;  %p1290_p12 = pnand %p1289_p4, %p1691_p6  ;;  %s1294_s23 = scalar_lea.vmem %s1293_s9, 256 }
  0x6c   : > { %992 = vmatpush3.bf16.msra.mxu0 %v1151_v2  ;;  %1012 = vmatpush3.bf16.msra.mxu1 %v1159_v6  ;;  %v1169_v21 = vld [vmem:[#allocation7 + $0x60] sm:$0xff]   ;;  %v1170_v22 = vld [vmem:[#allocation7 + $0x58] sm:$0xff]   ;;  %v1171_v23 = vld [vmem:[#allocation7 + $0x50] sm:$0xff]   ;;  %p1295_p5 = scmp.lt.s32.totalorder %s1621_s21, %s1293_s9  ;;  %p1296_p3 = scmp.lt.s32.totalorder %s1294_s23, %s1288_s30 }
  0x6d   : > { %993 = vmatprep.subr.bf16.mxu0 %v1368_v0  ;;  %1013 = vmatprep.subr.bf16.mxu1 %v1368_v0  ;;  %v356_v26 = vld [vmem:[%s1664_s2] sm:$0x1]  ;;  %v1172_v37 = vld [vmem:[#allocation7 + $0x48] sm:$0xff]   ;;  %v1173_v38 = vld [vmem:[#allocation7 + $0x40] sm:$0xff]   ;;  %p1291_p0 = pneg %p1290_p12 }
  0x6e   : > { %v357_v27 = vunpack.c.l.bf16 %v356_v26  ;;  %v1174_v39 = vld [vmem:[#allocation8 + $0x38] sm:$0xff]   ;;  %v1175_v40 = vld [vmem:[#allocation8 + $0x30] sm:$0xff]   ;;  %v1176_v41 = vld [vmem:[#allocation8 + $0x28] sm:$0xff]   ;;  %p1297_p7 = por %p1296_p3, %p1295_p5 }
  0x6f   : > { %v1177_v42 = vld [vmem:[#allocation8 + $0x20] sm:$0xff]   ;;  %v1178_v43 = vld [vmem:[#allocation8 + $0x18] sm:$0xff]   ;;  %v1179_v44 = vld [vmem:[#allocation8 + $0x10] sm:$0xff]  }
  0x70   : > { %994 = vmatpush3.bf16.msra.mxu0 %v1152_v3  ;;  %1014 = vmatpush3.bf16.msra.mxu1 %v1160_v8  ;;  %v361_v29 = vrot.slane %v357_v27, %v1589_v28  ;;  %v468_v45 = vld [vmem:[%s1666_s4] sm:$0x1]  ;;  %v1180_v55 = vld [vmem:[#allocation8 + $0x8] sm:$0xff]   ;;  %v1181_v56 = vld [vmem:[#allocation8] sm:$0xff]   ;;  %p1298_p9 = pnand %p1297_p7, %p1291_p0 }
  0x71   : > { %995 = vmatprep.subr.bf16.mxu0 %v1368_v0  ;;  %1015 = vmatprep.subr.bf16.mxu1 %v1368_v0  ;;  %v469_v46 = vunpack.c.l.bf16 %v468_v45  ;;  %v932_v57 = vld [vmem:[%s1666_s4 + $0x1] sm:$0x1] }
  0x72   : > { %v583_v58 = vunpack.c.l.bf16 %v932_v57 }
  0x73   : > { %v473_v47 = vrot.slane %v469_v46, %v1589_v28 }
  0x74   : > { %996 = vmatpush3.bf16.msra.mxu0 %v1153_v5  ;;  %1016 = vmatpush3.bf16.msra.mxu1 %v1161_v10  ;;  %v587_v59 = vrot.slane %v583_v58, %v1589_v28 }
  0x75   : > { %997 = vmatprep.subr.bf16.mxu0 %v1368_v0  ;;  %1017 = vmatprep.subr.bf16.mxu1 %v1368_v0 }
  0x78   : > { %998 = vmatpush3.bf16.msra.mxu0 %v1154_v7  ;;  %1018 = vmatpush3.bf16.msra.mxu1 %v1162_v12 }
  0x79   : > { %999 = vmatprep.subr.bf16.mxu0 %v1368_v0  ;;  %1019 = vmatprep.subr.bf16.mxu1 %v1368_v0 }
  0x7c   : > { %1000 = vmatpush3.bf16.msra.mxu0 %v1155_v9  ;;  %1020 = vmatpush3.bf16.msra.mxu1 %v1163_v14 }
  0x7d   : > { %1001 = vmatprep.subr.bf16.mxu0 %v1368_v0  ;;  %1021 = vmatprep.subr.bf16.mxu1 %v1368_v0 }
  0x80   : > { %1002 = vmatpush3.bf16.msra.mxu0 %v1156_v11  ;;  %1022 = vmatpush3.bf16.msra.mxu1 %v1164_v16 }
  0x81   : > { %1003 = vmatprep.subr.bf16.mxu0 %v1368_v0  ;;  %1023 = vmatprep.subr.bf16.mxu1 %v1368_v0 }
  0x84   : > { %1004 = vmatpush3.bf16.msra.mxu0 %v1157_v13  ;;  %1024 = vmatpush3.bf16.msra.mxu1 %v1165_v17 }
  0x85   : > { %1029 = vmatprep.subr.bf16.mxu0 %v1368_v0  ;;  %1049 = vmatprep.subr.bf16.mxu1 %v1368_v0 }
  0x87   : > { %1006 = vmatmul.mubr.bf16.vlgmr.msra.gmra.mxu0 %v339_v15 }
  0x88   : > { %1045 = vmatprep.mubr.msk.bf16.mxu0 %vm1369_vm0, %v1368_v0  ;;  %1030 = vmatpush3.bf16.msra.mxu0 %v1166_v18 }
  0x89   : > { %1031 = vmatprep.subr.bf16.mxu0 %v1368_v0 }
  0x8c   : > { %1032 = vmatpush3.bf16.msra.mxu0 %v1167_v19 }
  0x8d   : > { %1033 = vmatprep.subr.bf16.mxu0 %v1368_v0 }
  0x90   : > { %1034 = vmatpush3.bf16.msra.mxu0 %v1168_v20 }
  0x91   : > { %1035 = vmatprep.subr.bf16.mxu0 %v1368_v0 }
  0x94   : > { %1036 = vmatpush3.bf16.msra.mxu0 %v1169_v21 }
  0x95   : > { %1037 = vmatprep.subr.bf16.mxu0 %v1368_v0 }
  0x98   : > { %1038 = vmatpush3.bf16.msra.mxu0 %v1170_v22 }
  0x99   : > { %1039 = vmatprep.subr.bf16.mxu0 %v1368_v0 }
  0x9c   : > { %1040 = vmatpush3.bf16.msra.mxu0 %v1171_v23 }
  0x9d   : > { %1041 = vmatprep.subr.bf16.mxu0 %v1368_v0 }
  0xa0   : > { %1042 = vmatpush3.bf16.msra.mxu0 %v1172_v37 }
  0xa1   : > { %1043 = vmatprep.subr.bf16.mxu0 %v1368_v0 }
  0xa4   : > { %1044 = vmatpush3.bf16.msra.mxu0 %v1173_v38 }
 0x147   : > { %v444_v30 = vpop.f32.mrf.mxu0 }
 0x148   : > { %v445_v31 = vadd.f32 %v444_v30, %v361_v29 }
 0x149   : > { %v1007_v32 = vpop.f32.mrf.mxu0 }
 0x14a   : > { %v450_v33 = vmax.f32 %v445_v31, 0.0 }
 0x14b   : > { %v447_v34 = vpop.f32.mrf.mxu0 }
 0x14c   : > { %v451_v35 = vpack.c.bf16 %v450_v33, %v450_v33 }
 0x14d   : > { %v1008_v36 = vpop.f32.mrf.mxu0 }
 0x14e   : > { %1026 = vmatmul.mubr.bf16.vlgmr.msra.gmra.mxu1 %v451_v35 }
 0x14f   : > { %1065 = vmatprep.mubr.msk.bf16.mxu1 %vm1369_vm0, %v1368_v0  ;;  %1050 = vmatpush3.bf16.msra.mxu1 %v1174_v39 }
 0x150   : > { %1051 = vmatprep.subr.bf16.mxu1 %v1368_v0 }
 0x153   : > { %1052 = vmatpush3.bf16.msra.mxu1 %v1175_v40 }
 0x154   : > { %1053 = vmatprep.subr.bf16.mxu1 %v1368_v0 }
 0x157   : > { %1054 = vmatpush3.bf16.msra.mxu1 %v1176_v41 }
 0x158   : > { %1055 = vmatprep.subr.bf16.mxu1 %v1368_v0 }
 0x15b   : > { %1056 = vmatpush3.bf16.msra.mxu1 %v1177_v42 }
 0x15c   : > { %1057 = vmatprep.subr.bf16.mxu1 %v1368_v0 }
 0x15f   : > { %1058 = vmatpush3.bf16.msra.mxu1 %v1178_v43 }
 0x160   : > { %1059 = vmatprep.subr.bf16.mxu1 %v1368_v0 }
 0x163   : > { %1060 = vmatpush3.bf16.msra.mxu1 %v1179_v44 }
 0x164   : > { %1061 = vmatprep.subr.bf16.mxu1 %v1368_v0 }
 0x167   : > { %1062 = vmatpush3.bf16.msra.mxu1 %v1180_v55 }
 0x168   : > { %1063 = vmatprep.subr.bf16.mxu1 %v1368_v0  ;;  %v694_v0 = vld [vmem:[%s1668_s6] sm:$0x1] }
 0x169   : > { %v695_v4 = vunpack.c.l.bf16 %v694_v0 }
 0x16b   : > { %1064 = vmatpush3.bf16.msra.mxu1 %v1181_v56  ;;  %v699_v5 = vrot.slane %v695_v4, %v1589_v28 }
 0x20e   : > { %v556_v48 = vpop.f32.mrf.mxu1 }
 0x20f   : > { %v557_v49 = vadd.f32 %v556_v48, %v473_v47 }
 0x210   : > { %v1027_v50 = vpop.f32.mrf.mxu1 }
 0x211   : > { %v562_v51 = vmax.f32 %v557_v49, 0.0 }
 0x212   : > { %v559_v52 = vpop.f32.mrf.mxu1 }
 0x213   : > { %v563_v53 = vpack.c.bf16 %v562_v51, %v562_v51 }
 0x214   : > { %v1028_v54 = vpop.f32.mrf.mxu1 }
 0x215   : > { %1046 = vmatmul.mubr.bf16.vlgmr.msra.gmra.mxu0 %v563_v53 }
 0x2d5   : > { %v670_v60 = vpop.f32.mrf.mxu0 }
 0x2d6   : > { %v671_v61 = vadd.f32 %v670_v60, %v587_v59 }
 0x2d7   : > { %v1047_v62 = vpop.f32.mrf.mxu0 }
 0x2d8   : > { %v676_v63 = vmax.f32 %v671_v61, 0.0 }
 0x2d9   : > { %v673_v1 = vpop.f32.mrf.mxu0 }
 0x2da   : > { %v677_v2 = vpack.c.bf16 %v676_v63, %v676_v63 }
 0x2db   : > { %v1048_v3 = vpop.f32.mrf.mxu0 }
 0x2dc   : > { %1066 = vmatmul.mubr.bf16.vlgmr.msra.gmra.mxu1 %v677_v2 }
 0x39c   : > { %v782_v6 = vpop.f32.mrf.mxu1 }
 0x39d   : > { %v783_v7 = vadd.f32 %v782_v6, %v699_v5 }
 0x39e   : > { %v1067_v8 = vpop.f32.mrf.mxu1 }
 0x39f   : > { %788 = vst [vmem:[%s337_s29] sm:$0xff] %v783_v7 }
 0x3a0   : > { %v785_v9 = vpop.f32.mrf.mxu1 }
 0x3a1   : > { %1301 = shalt.err (!%p1298_p9)
}
 0x3a2   : > { %s1302_s10 = scalar_lea.hbm %s1619_s1, 128  ;;  %s1306_s13 = scalar_lea.hbm %s1669_s7, 256 }
 0x3a3   : > { %p1303_p13 = scmp.ne.s32.totalorder %s1619_s1, %s1302_s10  ;;  %p1307_p10 = scmp.lt.s32.totalorder %s1619_s1, %s1669_s7 }
 0x3a4   : > { %p1308_p11 = scmp.lt.s32.totalorder %s1306_s13, %s1302_s10 }
 0x3a5   : > { %p1304_p1 = pnand %p1303_p13, %p1691_p6 }
 0x3a6   : > { %p1309_p2 = por %p1308_p11, %p1307_p10 }
 0x3a7   : > { %p1305_p8 = pneg %p1304_p1 }
 0x3a9   : > { %p1310_p4 = pnand %p1309_p2, %p1305_p8 }
 0x3ab   : > { %1313 = shalt.err (!%p1310_p4)
}
 0x3ac   : > { %1083 = dma.vmem_to_hbm [thread:$0]  (%p1691_p6), %s1621_s21, 128, %s1619_s1, %s790_s3   ;;  %v1068_v10 = vpop.f32.mrf.mxu1 }
 0x3ad PF: > { %s815_s16 = sand.u32 1, %s1348_s24   ;;  %p1692_p12 = scmp.ne.s32.totalorder %s1677_s8, 0 }
 0x3ae   : > { %p1693_p0 = scmp.ge.s32.totalorder %s1360_s27, 2  ;;  %s816_s29 = scalar_lea.sflag [#allocation4], %s815_s16 }
 0x3b0   : > { %p1100_p5 = pnand %p1693_p0, %p1692_p12 }
 0x3b2   : > { %p1101_p3 = pneg %p1100_p5 }
 0x3b4   : > { %1343 = dma.done.wait (%p1101_p3), %s816_s29, 128  }
 0x3b5   : > { %1345 = vsyncadd (%p1101_p3), %s816_s29, 4294967168  ;;  %p22_p7 = scmp.ge.s32.totalorder %s1491_s14, 4   ;;  %s1694_s24 = smov %s1352_s25 }
 0x3b6   : > { %s1695_s25 = smov %s1356_s26  ;;  %s1696_s26 = smov %s1501_s17 }
 0x3b7   : > { %s1697_s27 = smov %s1491_s14  ;;  %24 = sbr.rel (!%p22_p7) target bundleno = 10 (0xa), region = 107 }
 0x3bc   :  { %821 = vsyncpa [#allocation3], 1 }
 0x3bd   :  { %823 = vsyncpa [#allocation3 + $0x1], 1 }
 0x3be   :  { %824 = vsyncpa [#allocation6], 1 }
 0x3bf   :  { %825 = vsyncpa [#allocation9], 1 }
 0x3c0   :  { %826 = vsyncpa [#allocation4], 1 }
 0x3c1   :  { %828 = vsyncpa [#allocation4 + $0x1], 1 }

</bundles_post_ra>
